<compile_context>
chip_gen: v7x
topology: tpu7x:2x2x1
jax: 0.10.0
libtpu: 0.0.40
codegen_flags: <defaults>
</compile_context>

<pallas_src>
import functools

import jax
import jax.numpy as jnp
from jax import lax
from jax.experimental import pallas as pl
from jax.experimental.pallas import tpu as pltpu

PAD_ID = 1


def _fused_encoder_kernel(ids_smem, ids_ref, emb_hbm, w_ref, bias_ref, o_ref,
                          emb_buf, sem, *, seq, h):
    b = pl.program_id(0)

    # 1) DMA-gather this batch row's token embeddings straight from HBM.
    copies = []
    for t in range(seq):
        tok = ids_smem[b, t]
        cp = pltpu.make_async_copy(emb_hbm.at[tok], emb_buf.at[t], sem.at[t])
        cp.start()
        copies.append(cp)

    # 2) While the DMAs fly: build the pooling weight vector with the pad mask
    #    and the (approx) reciprocal token count folded in.
    ids_row = ids_ref[pl.ds(b, 1), :]                       # (1, S) int32
    maskf = (ids_row != PAD_ID).astype(jnp.float32)         # (1, S)
    count = jnp.sum(maskf, axis=1, keepdims=True)           # (1, 1)
    # Faithful to the reference: an all-pad row (count == 0) yields NaN/Inf.
    wvec = maskf * pl.reciprocal(count, approx=True)        # (1, S)

    for cp in copies:
        cp.wait()

    # 3) Synthetic encoder layer on the MXU: bf16 operands, f32 accumulation.
    # TODO(synk): attention_mask is not consumed by this synthetic encoder
    # (a real transformer encoder would use it inside attention).
    x = emb_buf[...].astype(jnp.bfloat16)                   # (S, Hp)
    y = jnp.tanh(
        jnp.dot(x, w_ref[...], preferred_element_type=jnp.float32)
        + bias_ref[...]
    )                                                       # (S, Hp) f32

    # 4) Masked-mean pooling as a tiny (1, S) @ (S, Hp) contraction.
    pooled = jnp.dot(wvec, y, preferred_element_type=jnp.float32)   # (1, Hp)

    # 5) L2 normalize (torch F.normalize p=2, dim=1); padded columns of pooled
    #    are exactly zero so sumsq is exact; store only the H real columns.
    sumsq = jnp.sum(pooled * pooled, axis=1, keepdims=True)
    normed = pooled * lax.rsqrt(jnp.maximum(sumsq, 1e-24))
    o_ref[0] = normed[:, :h]


def prepare_params(emb_table, w_dense, b_dense):
    """One-time parameter prep: pad hidden dim to a lane-dense multiple of 128,
    cast the dense weight to bf16 for the MXU.  Padded columns are zero, so
    they stay exactly zero through tanh/pooling/normalization."""
    _, h = emb_table.shape
    hp = ((h + 127) // 128) * 128
    emb_p = jnp.pad(emb_table.astype(jnp.float32), ((0, 0), (0, hp - h)))
    w_p = jnp.pad(w_dense.astype(jnp.float32),
                  ((0, hp - h), (0, hp - h))).astype(jnp.bfloat16)
    bias_p = jnp.pad(b_dense.astype(jnp.float32), ((0, 0), (0, hp - h)))
    return emb_p, w_p, bias_p


@functools.partial(jax.jit, static_argnames=("h",))
def model_forward(token_ids, emb_p, w_p, bias_p, *, h):
    b, s = token_ids.shape
    _, hp = emb_p.shape
    kernel = functools.partial(_fused_encoder_kernel, seq=s, h=h)

    out3 = pl.pallas_call(
        kernel,
        out_shape=jax.ShapeDtypeStruct((b, 1, h), jnp.float32),
        grid_spec=pltpu.PrefetchScalarGridSpec(
            num_scalar_prefetch=1,            # token ids -> SMEM, drive the gather
            grid=(b,),                        # one batch row per grid step
            in_specs=[
                # lane-dense ids (full tiny block, resident; dynamic row slice in-kernel)
                pl.BlockSpec((b, s), lambda i, ids: (0, 0)),
                # embedding table stays in HBM; rows are DMA-gathered manually
                pl.BlockSpec(memory_space=pl.ANY),
                # dense weight / bias: constant index_map -> resident in VMEM
                pl.BlockSpec((hp, hp), lambda i, ids: (0, 0)),
                pl.BlockSpec((1, hp), lambda i, ids: (0, 0)),
            ],
            out_specs=pl.BlockSpec((1, 1, h), lambda i, ids: (i, 0, 0)),
            scratch_shapes=[
                pltpu.VMEM((s, hp), jnp.float32),     # gathered embedding rows
                pltpu.SemaphoreType.DMA((s,)),        # one sem per row copy
            ],
        ),
        compiler_params=pltpu.CompilerParams(
            dimension_semantics=("parallel",),        # v7x: one TC per batch row
        ),
    )(token_ids, token_ids, emb_p, w_p, bias_p)

    return out3.reshape(b, h)


if __name__ == "__main__":
    key = jax.random.PRNGKey(0)
    B, S, H, VOCAB = 2, 8, 32, 50
    k_ids, k_emb, k_w, k_b = jax.random.split(key, 4)

    # Deterministic synthetic parameters (no checkpoint loading).
    emb_table = jax.random.normal(k_emb, (VOCAB, H), dtype=jnp.float32) * 0.02
    w_dense = jax.random.normal(k_w, (H, H), dtype=jnp.float32) * 0.05
    b_dense = jax.random.normal(k_b, (1, H), dtype=jnp.float32) * 0.01

    # Token ids with pad tokens at the tail (pad id == 1, as in ids.ne(1)).
    token_ids = jax.random.randint(k_ids, (B, S), 0, VOCAB).astype(jnp.int32)
    token_ids = token_ids.at[0, S - 2:].set(PAD_ID)
    token_ids = token_ids.at[1, S - 1:].set(PAD_ID)

    params = prepare_params(emb_table, w_dense, b_dense)
    out = jax.block_until_ready(model_forward(token_ids, *params, h=H))

    # Pure-JAX reference of the same forward pass (operands rounded to bf16 at
    # the same points the kernel feeds the MXU, f32 accumulation everywhere).
    xe = jnp.take(emb_table, token_ids, axis=0)
    xe = xe.astype(jnp.bfloat16).astype(jnp.float32)                    # (B, S, H)
    w_bf = w_dense.astype(jnp.bfloat16).astype(jnp.float32)
    hid = jnp.tanh(
        jnp.einsum("bsh,hk->bsk", xe, w_bf, precision=lax.Precision.HIGHEST)
        + b_dense
    )
    m = (token_ids != PAD_ID).astype(jnp.float32)
    pooled = (hid * m[:, :, None]).sum(1) / m.sum(-1, keepdims=True)
    ref = pooled / jnp.maximum(jnp.linalg.norm(pooled, axis=1, keepdims=True), 1e-12)

    assert out.shape == (B, H)
    norms = jnp.linalg.norm(out, axis=1)
    assert jnp.allclose(norms, 1.0, atol=1e-5), norms
    err = float(jnp.max(jnp.abs(out - ref)))
    assert jnp.allclose(out, ref, atol=5e-3, rtol=5e-3), err

    print("KERNEL_OK")
</pallas_src>

<mosaic_0001>
module attributes {stable_mosaic.version = 11 : i64} {
  func.func @_fused_encoder_kernel(%arg0: i32, %arg1: memref<2x8xi32, #tpu.memory_space<smem>>, %arg2: memref<2x8xi32, #tpu.memory_space<vmem>>, %arg3: memref<50x128xf32, #tpu.memory_space<any>>, %arg4: memref<128x128xbf16, #tpu.memory_space<vmem>>, %arg5: memref<1x128xf32, #tpu.memory_space<vmem>>, %arg6: memref<1x1x32xf32, #tpu.memory_space<vmem>>, %arg7: memref<8x128xf32, #tpu.memory_space<vmem>>, %arg8: memref<8x!tpu.dma_semaphore, #tpu.memory_space<semaphore_mem>>) attributes {dimension_semantics = [#tpu.dimension_semantics<parallel>], iteration_bounds = array<i64: 2>, scalar_prefetch = 1 : i64, scratch_operands = 2 : i64, tpu.core_type = #tpu.core_type<tc>, window_params = [{pipeline_mode = #tpu.pipeline_mode<synchronous>, transform_indices = @transform_0, window_bounds = array<i64: 2, 8>}, {}, {pipeline_mode = #tpu.pipeline_mode<synchronous>, transform_indices = @transform_2, window_bounds = array<i64: 128, 128>}, {pipeline_mode = #tpu.pipeline_mode<synchronous>, transform_indices = @transform_3, window_bounds = array<i64: 1, 128>}, {transform_indices = @transform_4, window_bounds = array<i64: 1, 1, 32>}]} {
    %0 = arith.index_cast %arg0 : i32 to index
    %c0 = arith.constant 0 : index
    %1 = memref.load %arg1[%0, %c0] : memref<2x8xi32, #tpu.memory_space<smem>>
    %c0_i32 = arith.constant 0 : i32
    %c0_i32_0 = arith.constant 0 : i32
    %c0_i32_1 = arith.constant 0 : i32
    %2 = tpu.memref_slice %arg3[%1, %c0_i32_1] : memref<50x128xf32, #tpu.memory_space<any>> -> memref<1x128xf32, #tpu.memory_space<any>>
    %3 = tpu.memref_squeeze %2 : memref<1x128xf32, #tpu.memory_space<any>> -> memref<128xf32, #tpu.memory_space<any>>
    %c0_i32_2 = arith.constant 0 : i32
    %4 = tpu.memref_slice %arg7[%c0_i32, %c0_i32_2] : memref<8x128xf32, #tpu.memory_space<vmem>> -> memref<1x128xf32, #tpu.memory_space<vmem>>
    %5 = tpu.memref_squeeze %4 : memref<1x128xf32, #tpu.memory_space<vmem>> -> memref<128xf32, #tpu.memory_space<vmem>>
    %6 = tpu.memref_slice %arg8[%c0_i32_0] : memref<8x!tpu.dma_semaphore, #tpu.memory_space<semaphore_mem>> -> memref<1x!tpu.dma_semaphore, #tpu.memory_space<semaphore_mem>>
    %7 = tpu.memref_squeeze %6 : memref<1x!tpu.dma_semaphore, #tpu.memory_space<semaphore_mem>> -> memref<!tpu.dma_semaphore, #tpu.memory_space<semaphore_mem>>
    tpu.enqueue_dma source(%3 : memref<128xf32, #tpu.memory_space<any>>) target(%5 : memref<128xf32, #tpu.memory_space<vmem>>) target_semaphore(%7 : memref<!tpu.dma_semaphore, #tpu.memory_space<semaphore_mem>>)
    %8 = arith.index_cast %arg0 : i32 to index
    %c1 = arith.constant 1 : index
    %9 = memref.load %arg1[%8, %c1] : memref<2x8xi32, #tpu.memory_space<smem>>
    %c1_i32 = arith.constant 1 : i32
    %c1_i32_3 = arith.constant 1 : i32
    %c0_i32_4 = arith.constant 0 : i32
    %10 = tpu.memref_slice %arg3[%9, %c0_i32_4] : memref<50x128xf32, #tpu.memory_space<any>> -> memref<1x128xf32, #tpu.memory_space<any>>
    %11 = tpu.memref_squeeze %10 : memref<1x128xf32, #tpu.memory_space<any>> -> memref<128xf32, #tpu.memory_space<any>>
    %c0_i32_5 = arith.constant 0 : i32
    %12 = tpu.memref_slice %arg7[%c1_i32, %c0_i32_5] : memref<8x128xf32, #tpu.memory_space<vmem>> -> memref<1x128xf32, #tpu.memory_space<vmem>>
    %13 = tpu.memref_squeeze %12 : memref<1x128xf32, #tpu.memory_space<vmem>> -> memref<128xf32, #tpu.memory_space<vmem>>
    %14 = tpu.memref_slice %arg8[%c1_i32_3] : memref<8x!tpu.dma_semaphore, #tpu.memory_space<semaphore_mem>> -> memref<1x!tpu.dma_semaphore, #tpu.memory_space<semaphore_mem>>
    %15 = tpu.memref_squeeze %14 : memref<1x!tpu.dma_semaphore, #tpu.memory_space<semaphore_mem>> -> memref<!tpu.dma_semaphore, #tpu.memory_space<semaphore_mem>>
    tpu.enqueue_dma source(%11 : memref<128xf32, #tpu.memory_space<any>>) target(%13 : memref<128xf32, #tpu.memory_space<vmem>>) target_semaphore(%15 : memref<!tpu.dma_semaphore, #tpu.memory_space<semaphore_mem>>)
    %16 = arith.index_cast %arg0 : i32 to index
    %c2 = arith.constant 2 : index
    %17 = memref.load %arg1[%16, %c2] : memref<2x8xi32, #tpu.memory_space<smem>>
    %c2_i32 = arith.constant 2 : i32
    %c2_i32_6 = arith.constant 2 : i32
    %c0_i32_7 = arith.constant 0 : i32
    %18 = tpu.memref_slice %arg3[%17, %c0_i32_7] : memref<50x128xf32, #tpu.memory_space<any>> -> memref<1x128xf32, #tpu.memory_space<any>>
    %19 = tpu.memref_squeeze %18 : memref<1x128xf32, #tpu.memory_space<any>> -> memref<128xf32, #tpu.memory_space<any>>
    %c0_i32_8 = arith.constant 0 : i32
    %20 = tpu.memref_slice %arg7[%c2_i32, %c0_i32_8] : memref<8x128xf32, #tpu.memory_space<vmem>> -> memref<1x128xf32, #tpu.memory_space<vmem>>
    %21 = tpu.memref_squeeze %20 : memref<1x128xf32, #tpu.memory_space<vmem>> -> memref<128xf32, #tpu.memory_space<vmem>>
    %22 = tpu.memref_slice %arg8[%c2_i32_6] : memref<8x!tpu.dma_semaphore, #tpu.memory_space<semaphore_mem>> -> memref<1x!tpu.dma_semaphore, #tpu.memory_space<semaphore_mem>>
    %23 = tpu.memref_squeeze %22 : memref<1x!tpu.dma_semaphore, #tpu.memory_space<semaphore_mem>> -> memref<!tpu.dma_semaphore, #tpu.memory_space<semaphore_mem>>
    tpu.enqueue_dma source(%19 : memref<128xf32, #tpu.memory_space<any>>) target(%21 : memref<128xf32, #tpu.memory_space<vmem>>) target_semaphore(%23 : memref<!tpu.dma_semaphore, #tpu.memory_space<semaphore_mem>>)
    %24 = arith.index_cast %arg0 : i32 to index
    %c3 = arith.constant 3 : index
    %25 = memref.load %arg1[%24, %c3] : memref<2x8xi32, #tpu.memory_space<smem>>
    %c3_i32 = arith.constant 3 : i32
    %c3_i32_9 = arith.constant 3 : i32
    %c0_i32_10 = arith.constant 0 : i32
    %26 = tpu.memref_slice %arg3[%25, %c0_i32_10] : memref<50x128xf32, #tpu.memory_space<any>> -> memref<1x128xf32, #tpu.memory_space<any>>
    %27 = tpu.memref_squeeze %26 : memref<1x128xf32, #tpu.memory_space<any>> -> memref<128xf32, #tpu.memory_space<any>>
    %c0_i32_11 = arith.constant 0 : i32
    %28 = tpu.memref_slice %arg7[%c3_i32, %c0_i32_11] : memref<8x128xf32, #tpu.memory_space<vmem>> -> memref<1x128xf32, #tpu.memory_space<vmem>>
    %29 = tpu.memref_squeeze %28 : memref<1x128xf32, #tpu.memory_space<vmem>> -> memref<128xf32, #tpu.memory_space<vmem>>
    %30 = tpu.memref_slice %arg8[%c3_i32_9] : memref<8x!tpu.dma_semaphore, #tpu.memory_space<semaphore_mem>> -> memref<1x!tpu.dma_semaphore, #tpu.memory_space<semaphore_mem>>
    %31 = tpu.memref_squeeze %30 : memref<1x!tpu.dma_semaphore, #tpu.memory_space<semaphore_mem>> -> memref<!tpu.dma_semaphore, #tpu.memory_space<semaphore_mem>>
    tpu.enqueue_dma source(%27 : memref<128xf32, #tpu.memory_space<any>>) target(%29 : memref<128xf32, #tpu.memory_space<vmem>>) target_semaphore(%31 : memref<!tpu.dma_semaphore, #tpu.memory_space<semaphore_mem>>)
    %32 = arith.index_cast %arg0 : i32 to index
    %c4 = arith.constant 4 : index
    %33 = memref.load %arg1[%32, %c4] : memref<2x8xi32, #tpu.memory_space<smem>>
    %c4_i32 = arith.constant 4 : i32
    %c4_i32_12 = arith.constant 4 : i32
    %c0_i32_13 = arith.constant 0 : i32
    %34 = tpu.memref_slice %arg3[%33, %c0_i32_13] : memref<50x128xf32, #tpu.memory_space<any>> -> memref<1x128xf32, #tpu.memory_space<any>>
    %35 = tpu.memref_squeeze %34 : memref<1x128xf32, #tpu.memory_space<any>> -> memref<128xf32, #tpu.memory_space<any>>
    %c0_i32_14 = arith.constant 0 : i32
    %36 = tpu.memref_slice %arg7[%c4_i32, %c0_i32_14] : memref<8x128xf32, #tpu.memory_space<vmem>> -> memref<1x128xf32, #tpu.memory_space<vmem>>
    %37 = tpu.memref_squeeze %36 : memref<1x128xf32, #tpu.memory_space<vmem>> -> memref<128xf32, #tpu.memory_space<vmem>>
    %38 = tpu.memref_slice %arg8[%c4_i32_12] : memref<8x!tpu.dma_semaphore, #tpu.memory_space<semaphore_mem>> -> memref<1x!tpu.dma_semaphore, #tpu.memory_space<semaphore_mem>>
    %39 = tpu.memref_squeeze %38 : memref<1x!tpu.dma_semaphore, #tpu.memory_space<semaphore_mem>> -> memref<!tpu.dma_semaphore, #tpu.memory_space<semaphore_mem>>
    tpu.enqueue_dma source(%35 : memref<128xf32, #tpu.memory_space<any>>) target(%37 : memref<128xf32, #tpu.memory_space<vmem>>) target_semaphore(%39 : memref<!tpu.dma_semaphore, #tpu.memory_space<semaphore_mem>>)
    %40 = arith.index_cast %arg0 : i32 to index
    %c5 = arith.constant 5 : index
    %41 = memref.load %arg1[%40, %c5] : memref<2x8xi32, #tpu.memory_space<smem>>
    %c5_i32 = arith.constant 5 : i32
    %c5_i32_15 = arith.constant 5 : i32
    %c0_i32_16 = arith.constant 0 : i32
    %42 = tpu.memref_slice %arg3[%41, %c0_i32_16] : memref<50x128xf32, #tpu.memory_space<any>> -> memref<1x128xf32, #tpu.memory_space<any>>
    %43 = tpu.memref_squeeze %42 : memref<1x128xf32, #tpu.memory_space<any>> -> memref<128xf32, #tpu.memory_space<any>>
    %c0_i32_17 = arith.constant 0 : i32
    %44 = tpu.memref_slice %arg7[%c5_i32, %c0_i32_17] : memref<8x128xf32, #tpu.memory_space<vmem>> -> memref<1x128xf32, #tpu.memory_space<vmem>>
    %45 = tpu.memref_squeeze %44 : memref<1x128xf32, #tpu.memory_space<vmem>> -> memref<128xf32, #tpu.memory_space<vmem>>
    %46 = tpu.memref_slice %arg8[%c5_i32_15] : memref<8x!tpu.dma_semaphore, #tpu.memory_space<semaphore_mem>> -> memref<1x!tpu.dma_semaphore, #tpu.memory_space<semaphore_mem>>
    %47 = tpu.memref_squeeze %46 : memref<1x!tpu.dma_semaphore, #tpu.memory_space<semaphore_mem>> -> memref<!tpu.dma_semaphore, #tpu.memory_space<semaphore_mem>>
    tpu.enqueue_dma source(%43 : memref<128xf32, #tpu.memory_space<any>>) target(%45 : memref<128xf32, #tpu.memory_space<vmem>>) target_semaphore(%47 : memref<!tpu.dma_semaphore, #tpu.memory_space<semaphore_mem>>)
    %48 = arith.index_cast %arg0 : i32 to index
    %c6 = arith.constant 6 : index
    %49 = memref.load %arg1[%48, %c6] : memref<2x8xi32, #tpu.memory_space<smem>>
    %c6_i32 = arith.constant 6 : i32
    %c6_i32_18 = arith.constant 6 : i32
    %c0_i32_19 = arith.constant 0 : i32
    %50 = tpu.memref_slice %arg3[%49, %c0_i32_19] : memref<50x128xf32, #tpu.memory_space<any>> -> memref<1x128xf32, #tpu.memory_space<any>>
    %51 = tpu.memref_squeeze %50 : memref<1x128xf32, #tpu.memory_space<any>> -> memref<128xf32, #tpu.memory_space<any>>
    %c0_i32_20 = arith.constant 0 : i32
    %52 = tpu.memref_slice %arg7[%c6_i32, %c0_i32_20] : memref<8x128xf32, #tpu.memory_space<vmem>> -> memref<1x128xf32, #tpu.memory_space<vmem>>
    %53 = tpu.memref_squeeze %52 : memref<1x128xf32, #tpu.memory_space<vmem>> -> memref<128xf32, #tpu.memory_space<vmem>>
    %54 = tpu.memref_slice %arg8[%c6_i32_18] : memref<8x!tpu.dma_semaphore, #tpu.memory_space<semaphore_mem>> -> memref<1x!tpu.dma_semaphore, #tpu.memory_space<semaphore_mem>>
    %55 = tpu.memref_squeeze %54 : memref<1x!tpu.dma_semaphore, #tpu.memory_space<semaphore_mem>> -> memref<!tpu.dma_semaphore, #tpu.memory_space<semaphore_mem>>
    tpu.enqueue_dma source(%51 : memref<128xf32, #tpu.memory_space<any>>) target(%53 : memref<128xf32, #tpu.memory_space<vmem>>) target_semaphore(%55 : memref<!tpu.dma_semaphore, #tpu.memory_space<semaphore_mem>>)
    %56 = arith.index_cast %arg0 : i32 to index
    %c7 = arith.constant 7 : index
    %57 = memref.load %arg1[%56, %c7] : memref<2x8xi32, #tpu.memory_space<smem>>
    %c7_i32 = arith.constant 7 : i32
    %c7_i32_21 = arith.constant 7 : i32
    %c0_i32_22 = arith.constant 0 : i32
    %58 = tpu.memref_slice %arg3[%57, %c0_i32_22] : memref<50x128xf32, #tpu.memory_space<any>> -> memref<1x128xf32, #tpu.memory_space<any>>
    %59 = tpu.memref_squeeze %58 : memref<1x128xf32, #tpu.memory_space<any>> -> memref<128xf32, #tpu.memory_space<any>>
    %c0_i32_23 = arith.constant 0 : i32
    %60 = tpu.memref_slice %arg7[%c7_i32, %c0_i32_23] : memref<8x128xf32, #tpu.memory_space<vmem>> -> memref<1x128xf32, #tpu.memory_space<vmem>>
    %61 = tpu.memref_squeeze %60 : memref<1x128xf32, #tpu.memory_space<vmem>> -> memref<128xf32, #tpu.memory_space<vmem>>
    %62 = tpu.memref_slice %arg8[%c7_i32_21] : memref<8x!tpu.dma_semaphore, #tpu.memory_space<semaphore_mem>> -> memref<1x!tpu.dma_semaphore, #tpu.memory_space<semaphore_mem>>
    %63 = tpu.memref_squeeze %62 : memref<1x!tpu.dma_semaphore, #tpu.memory_space<semaphore_mem>> -> memref<!tpu.dma_semaphore, #tpu.memory_space<semaphore_mem>>
    tpu.enqueue_dma source(%59 : memref<128xf32, #tpu.memory_space<any>>) target(%61 : memref<128xf32, #tpu.memory_space<vmem>>) target_semaphore(%63 : memref<!tpu.dma_semaphore, #tpu.memory_space<semaphore_mem>>)
    %64 = arith.index_cast %arg0 : i32 to index
    %c0_24 = arith.constant 0 : index
    %65 = vector.load %arg2[%64, %c0_24] : memref<2x8xi32, #tpu.memory_space<vmem>>, vector<1x8xi32>
    %c1_i32_25 = arith.constant 1 : i32
    %66 = vector.broadcast %c1_i32_25 : i32 to vector<1x8xi32>
    %67 = arith.cmpi ne, %65, %66 : vector<1x8xi32>
    %68 = arith.extui %67 : vector<1x8xi1> to vector<1x8xi32>
    %69 = arith.sitofp %68 : vector<1x8xi32> to vector<1x8xf32>
    %cst = arith.constant dense<0.000000e+00> : vector<1xf32>
    %70 = vector.multi_reduction <add>, %69, %cst [1] : vector<1x8xf32> to vector<1xf32>
    %71 = vector.shape_cast %70 : vector<1xf32> to vector<1x1xf32>
    %72 = tpu.reciprocal %71 {approx = true} : vector<1x1xf32> -> vector<1x1xf32>
    %73 = vector.broadcast %72 : vector<1x1xf32> to vector<1x8xf32>
    %74 = arith.mulf %69, %73 : vector<1x8xf32>
    %c0_i32_26 = arith.constant 0 : i32
    %c0_i32_27 = arith.constant 0 : i32
    %c0_i32_28 = arith.constant 0 : i32
    %75 = tpu.memref_slice %arg3[%1, %c0_i32_28] : memref<50x128xf32, #tpu.memory_space<any>> -> memref<1x128xf32, #tpu.memory_space<any>>
    %76 = tpu.memref_squeeze %75 : memref<1x128xf32, #tpu.memory_space<any>> -> memref<128xf32, #tpu.memory_space<any>>
    %c0_i32_29 = arith.constant 0 : i32
    %77 = tpu.memref_slice %arg7[%c0_i32_26, %c0_i32_29] : memref<8x128xf32, #tpu.memory_space<vmem>> -> memref<1x128xf32, #tpu.memory_space<vmem>>
    %78 = tpu.memref_squeeze %77 : memref<1x128xf32, #tpu.memory_space<vmem>> -> memref<128xf32, #tpu.memory_space<vmem>>
    %79 = tpu.memref_slice %arg8[%c0_i32_27] : memref<8x!tpu.dma_semaphore, #tpu.memory_space<semaphore_mem>> -> memref<1x!tpu.dma_semaphore, #tpu.memory_space<semaphore_mem>>
    %80 = tpu.memref_squeeze %79 : memref<1x!tpu.dma_semaphore, #tpu.memory_space<semaphore_mem>> -> memref<!tpu.dma_semaphore, #tpu.memory_space<semaphore_mem>>
    tpu.wait_dma2 semaphore(%80 : memref<!tpu.dma_semaphore, #tpu.memory_space<semaphore_mem>>) src(%76 : memref<128xf32, #tpu.memory_space<any>>) dst(%78 : memref<128xf32, #tpu.memory_space<vmem>>)
    %c1_i32_30 = arith.constant 1 : i32
    %c1_i32_31 = arith.constant 1 : i32
    %c0_i32_32 = arith.constant 0 : i32
    %81 = tpu.memref_slice %arg3[%9, %c0_i32_32] : memref<50x128xf32, #tpu.memory_space<any>> -> memref<1x128xf32, #tpu.memory_space<any>>
    %82 = tpu.memref_squeeze %81 : memref<1x128xf32, #tpu.memory_space<any>> -> memref<128xf32, #tpu.memory_space<any>>
    %c0_i32_33 = arith.constant 0 : i32
    %83 = tpu.memref_slice %arg7[%c1_i32_30, %c0_i32_33] : memref<8x128xf32, #tpu.memory_space<vmem>> -> memref<1x128xf32, #tpu.memory_space<vmem>>
    %84 = tpu.memref_squeeze %83 : memref<1x128xf32, #tpu.memory_space<vmem>> -> memref<128xf32, #tpu.memory_space<vmem>>
    %85 = tpu.memref_slice %arg8[%c1_i32_31] : memref<8x!tpu.dma_semaphore, #tpu.memory_space<semaphore_mem>> -> memref<1x!tpu.dma_semaphore, #tpu.memory_space<semaphore_mem>>
    %86 = tpu.memref_squeeze %85 : memref<1x!tpu.dma_semaphore, #tpu.memory_space<semaphore_mem>> -> memref<!tpu.dma_semaphore, #tpu.memory_space<semaphore_mem>>
    tpu.wait_dma2 semaphore(%86 : memref<!tpu.dma_semaphore, #tpu.memory_space<semaphore_mem>>) src(%82 : memref<128xf32, #tpu.memory_space<any>>) dst(%84 : memref<128xf32, #tpu.memory_space<vmem>>)
    %c2_i32_34 = arith.constant 2 : i32
    %c2_i32_35 = arith.constant 2 : i32
    %c0_i32_36 = arith.constant 0 : i32
    %87 = tpu.memref_slice %arg3[%17, %c0_i32_36] : memref<50x128xf32, #tpu.memory_space<any>> -> memref<1x128xf32, #tpu.memory_space<any>>
    %88 = tpu.memref_squeeze %87 : memref<1x128xf32, #tpu.memory_space<any>> -> memref<128xf32, #tpu.memory_space<any>>
    %c0_i32_37 = arith.constant 0 : i32
    %89 = tpu.memref_slice %arg7[%c2_i32_34, %c0_i32_37] : memref<8x128xf32, #tpu.memory_space<vmem>> -> memref<1x128xf32, #tpu.memory_space<vmem>>
    %90 = tpu.memref_squeeze %89 : memref<1x128xf32, #tpu.memory_space<vmem>> -> memref<128xf32, #tpu.memory_space<vmem>>
    %91 = tpu.memref_slice %arg8[%c2_i32_35] : memref<8x!tpu.dma_semaphore, #tpu.memory_space<semaphore_mem>> -> memref<1x!tpu.dma_semaphore, #tpu.memory_space<semaphore_mem>>
    %92 = tpu.memref_squeeze %91 : memref<1x!tpu.dma_semaphore, #tpu.memory_space<semaphore_mem>> -> memref<!tpu.dma_semaphore, #tpu.memory_space<semaphore_mem>>
    tpu.wait_dma2 semaphore(%92 : memref<!tpu.dma_semaphore, #tpu.memory_space<semaphore_mem>>) src(%88 : memref<128xf32, #tpu.memory_space<any>>) dst(%90 : memref<128xf32, #tpu.memory_space<vmem>>)
    %c3_i32_38 = arith.constant 3 : i32
    %c3_i32_39 = arith.constant 3 : i32
    %c0_i32_40 = arith.constant 0 : i32
    %93 = tpu.memref_slice %arg3[%25, %c0_i32_40] : memref<50x128xf32, #tpu.memory_space<any>> -> memref<1x128xf32, #tpu.memory_space<any>>
    %94 = tpu.memref_squeeze %93 : memref<1x128xf32, #tpu.memory_space<any>> -> memref<128xf32, #tpu.memory_space<any>>
    %c0_i32_41 = arith.constant 0 : i32
    %95 = tpu.memref_slice %arg7[%c3_i32_38, %c0_i32_41] : memref<8x128xf32, #tpu.memory_space<vmem>> -> memref<1x128xf32, #tpu.memory_space<vmem>>
    %96 = tpu.memref_squeeze %95 : memref<1x128xf32, #tpu.memory_space<vmem>> -> memref<128xf32, #tpu.memory_space<vmem>>
    %97 = tpu.memref_slice %arg8[%c3_i32_39] : memref<8x!tpu.dma_semaphore, #tpu.memory_space<semaphore_mem>> -> memref<1x!tpu.dma_semaphore, #tpu.memory_space<semaphore_mem>>
    %98 = tpu.memref_squeeze %97 : memref<1x!tpu.dma_semaphore, #tpu.memory_space<semaphore_mem>> -> memref<!tpu.dma_semaphore, #tpu.memory_space<semaphore_mem>>
    tpu.wait_dma2 semaphore(%98 : memref<!tpu.dma_semaphore, #tpu.memory_space<semaphore_mem>>) src(%94 : memref<128xf32, #tpu.memory_space<any>>) dst(%96 : memref<128xf32, #tpu.memory_space<vmem>>)
    %c4_i32_42 = arith.constant 4 : i32
    %c4_i32_43 = arith.constant 4 : i32
    %c0_i32_44 = arith.constant 0 : i32
    %99 = tpu.memref_slice %arg3[%33, %c0_i32_44] : memref<50x128xf32, #tpu.memory_space<any>> -> memref<1x128xf32, #tpu.memory_space<any>>
    %100 = tpu.memref_squeeze %99 : memref<1x128xf32, #tpu.memory_space<any>> -> memref<128xf32, #tpu.memory_space<any>>
    %c0_i32_45 = arith.constant 0 : i32
    %101 = tpu.memref_slice %arg7[%c4_i32_42, %c0_i32_45] : memref<8x128xf32, #tpu.memory_space<vmem>> -> memref<1x128xf32, #tpu.memory_space<vmem>>
    %102 = tpu.memref_squeeze %101 : memref<1x128xf32, #tpu.memory_space<vmem>> -> memref<128xf32, #tpu.memory_space<vmem>>
    %103 = tpu.memref_slice %arg8[%c4_i32_43] : memref<8x!tpu.dma_semaphore, #tpu.memory_space<semaphore_mem>> -> memref<1x!tpu.dma_semaphore, #tpu.memory_space<semaphore_mem>>
    %104 = tpu.memref_squeeze %103 : memref<1x!tpu.dma_semaphore, #tpu.memory_space<semaphore_mem>> -> memref<!tpu.dma_semaphore, #tpu.memory_space<semaphore_mem>>
    tpu.wait_dma2 semaphore(%104 : memref<!tpu.dma_semaphore, #tpu.memory_space<semaphore_mem>>) src(%100 : memref<128xf32, #tpu.memory_space<any>>) dst(%102 : memref<128xf32, #tpu.memory_space<vmem>>)
    %c5_i32_46 = arith.constant 5 : i32
    %c5_i32_47 = arith.constant 5 : i32
    %c0_i32_48 = arith.constant 0 : i32
    %105 = tpu.memref_slice %arg3[%41, %c0_i32_48] : memref<50x128xf32, #tpu.memory_space<any>> -> memref<1x128xf32, #tpu.memory_space<any>>
    %106 = tpu.memref_squeeze %105 : memref<1x128xf32, #tpu.memory_space<any>> -> memref<128xf32, #tpu.memory_space<any>>
    %c0_i32_49 = arith.constant 0 : i32
    %107 = tpu.memref_slice %arg7[%c5_i32_46, %c0_i32_49] : memref<8x128xf32, #tpu.memory_space<vmem>> -> memref<1x128xf32, #tpu.memory_space<vmem>>
    %108 = tpu.memref_squeeze %107 : memref<1x128xf32, #tpu.memory_space<vmem>> -> memref<128xf32, #tpu.memory_space<vmem>>
    %109 = tpu.memref_slice %arg8[%c5_i32_47] : memref<8x!tpu.dma_semaphore, #tpu.memory_space<semaphore_mem>> -> memref<1x!tpu.dma_semaphore, #tpu.memory_space<semaphore_mem>>
    %110 = tpu.memref_squeeze %109 : memref<1x!tpu.dma_semaphore, #tpu.memory_space<semaphore_mem>> -> memref<!tpu.dma_semaphore, #tpu.memory_space<semaphore_mem>>
    tpu.wait_dma2 semaphore(%110 : memref<!tpu.dma_semaphore, #tpu.memory_space<semaphore_mem>>) src(%106 : memref<128xf32, #tpu.memory_space<any>>) dst(%108 : memref<128xf32, #tpu.memory_space<vmem>>)
    %c6_i32_50 = arith.constant 6 : i32
    %c6_i32_51 = arith.constant 6 : i32
    %c0_i32_52 = arith.constant 0 : i32
    %111 = tpu.memref_slice %arg3[%49, %c0_i32_52] : memref<50x128xf32, #tpu.memory_space<any>> -> memref<1x128xf32, #tpu.memory_space<any>>
    %112 = tpu.memref_squeeze %111 : memref<1x128xf32, #tpu.memory_space<any>> -> memref<128xf32, #tpu.memory_space<any>>
    %c0_i32_53 = arith.constant 0 : i32
    %113 = tpu.memref_slice %arg7[%c6_i32_50, %c0_i32_53] : memref<8x128xf32, #tpu.memory_space<vmem>> -> memref<1x128xf32, #tpu.memory_space<vmem>>
    %114 = tpu.memref_squeeze %113 : memref<1x128xf32, #tpu.memory_space<vmem>> -> memref<128xf32, #tpu.memory_space<vmem>>
    %115 = tpu.memref_slice %arg8[%c6_i32_51] : memref<8x!tpu.dma_semaphore, #tpu.memory_space<semaphore_mem>> -> memref<1x!tpu.dma_semaphore, #tpu.memory_space<semaphore_mem>>
    %116 = tpu.memref_squeeze %115 : memref<1x!tpu.dma_semaphore, #tpu.memory_space<semaphore_mem>> -> memref<!tpu.dma_semaphore, #tpu.memory_space<semaphore_mem>>
    tpu.wait_dma2 semaphore(%116 : memref<!tpu.dma_semaphore, #tpu.memory_space<semaphore_mem>>) src(%112 : memref<128xf32, #tpu.memory_space<any>>) dst(%114 : memref<128xf32, #tpu.memory_space<vmem>>)
    %c7_i32_54 = arith.constant 7 : i32
    %c7_i32_55 = arith.constant 7 : i32
    %c0_i32_56 = arith.constant 0 : i32
    %117 = tpu.memref_slice %arg3[%57, %c0_i32_56] : memref<50x128xf32, #tpu.memory_space<any>> -> memref<1x128xf32, #tpu.memory_space<any>>
    %118 = tpu.memref_squeeze %117 : memref<1x128xf32, #tpu.memory_space<any>> -> memref<128xf32, #tpu.memory_space<any>>
    %c0_i32_57 = arith.constant 0 : i32
    %119 = tpu.memref_slice %arg7[%c7_i32_54, %c0_i32_57] : memref<8x128xf32, #tpu.memory_space<vmem>> -> memref<1x128xf32, #tpu.memory_space<vmem>>
    %120 = tpu.memref_squeeze %119 : memref<1x128xf32, #tpu.memory_space<vmem>> -> memref<128xf32, #tpu.memory_space<vmem>>
    %121 = tpu.memref_slice %arg8[%c7_i32_55] : memref<8x!tpu.dma_semaphore, #tpu.memory_space<semaphore_mem>> -> memref<1x!tpu.dma_semaphore, #tpu.memory_space<semaphore_mem>>
    %122 = tpu.memref_squeeze %121 : memref<1x!tpu.dma_semaphore, #tpu.memory_space<semaphore_mem>> -> memref<!tpu.dma_semaphore, #tpu.memory_space<semaphore_mem>>
    tpu.wait_dma2 semaphore(%122 : memref<!tpu.dma_semaphore, #tpu.memory_space<semaphore_mem>>) src(%118 : memref<128xf32, #tpu.memory_space<any>>) dst(%120 : memref<128xf32, #tpu.memory_space<vmem>>)
    %c0_58 = arith.constant 0 : index
    %c0_59 = arith.constant 0 : index
    %123 = vector.load %arg7[%c0_58, %c0_59] : memref<8x128xf32, #tpu.memory_space<vmem>>, vector<8x128xf32>
    %124 = arith.truncf %123 : vector<8x128xf32> to vector<8x128xbf16>
    %c0_60 = arith.constant 0 : index
    %c0_61 = arith.constant 0 : index
    %125 = vector.load %arg4[%c0_60, %c0_61] : memref<128x128xbf16, #tpu.memory_space<vmem>>, vector<128x128xbf16>
    %cst_62 = arith.constant dense<0.000000e+00> : vector<8x128xf32>
    %126 = tpu.matmul %124, %125, %cst_62 {dimension_numbers = #tpu.dot_dimension_numbers<[1], [0], [0], [1], [0, 0, 1, 1], [], []>} : vector<8x128xbf16>, vector<128x128xbf16>, vector<8x128xf32> -> vector<8x128xf32>
    %c0_63 = arith.constant 0 : index
    %c0_64 = arith.constant 0 : index
    %127 = vector.load %arg5[%c0_63, %c0_64] : memref<1x128xf32, #tpu.memory_space<vmem>>, vector<1x128xf32>
    %128 = vector.broadcast %127 : vector<1x128xf32> to vector<8x128xf32>
    %129 = arith.addf %126, %128 : vector<8x128xf32>
    %130 = math.tanh %129 : vector<8x128xf32>
    %cst_65 = arith.constant dense<0.000000e+00> : vector<1x128xf32>
    %131 = tpu.matmul %74, %130, %cst_65 {dimension_numbers = #tpu.dot_dimension_numbers<[1], [0], [0], [1], [0, 0, 1, 1], [], []>} : vector<1x8xf32>, vector<8x128xf32>, vector<1x128xf32> -> vector<1x128xf32>
    %132 = arith.mulf %131, %131 : vector<1x128xf32>
    %cst_66 = arith.constant dense<0.000000e+00> : vector<1xf32>
    %133 = vector.multi_reduction <add>, %132, %cst_66 [1] : vector<1x128xf32> to vector<1xf32>
    %134 = vector.shape_cast %133 : vector<1xf32> to vector<1x1xf32>
    %cst_67 = arith.constant 1.000000e-24 : f32
    %135 = vector.broadcast %cst_67 : f32 to vector<1x1xf32>
    %136 = arith.maximumf %134, %135 : vector<1x1xf32>
    %137 = math.rsqrt %136 : vector<1x1xf32>
    %138 = vector.broadcast %137 : vector<1x1xf32> to vector<1x128xf32>
    %139 = arith.mulf %131, %138 : vector<1x128xf32>
    %140 = vector.extract_strided_slice %139 {offsets = [0, 0], sizes = [1, 32], strides = [1, 1]} : vector<1x128xf32> to vector<1x32xf32>
    %c0_68 = arith.constant 0 : index
    %c0_69 = arith.constant 0 : index
    %c0_70 = arith.constant 0 : index
    %141 = vector.load %arg6[%c0_68, %c0_69, %c0_70] : memref<1x1x32xf32, #tpu.memory_space<vmem>>, vector<1x1x32xf32>
    %142 = vector.shape_cast %141 : vector<1x1x32xf32> to vector<1x32xf32>
    %143 = vector.shape_cast %140 : vector<1x32xf32> to vector<1x1x32xf32>
    tpu.vector_store %arg6[%c0_68, %c0_69, %c0_70], %143 {strides = array<i32>} : memref<1x1x32xf32, #tpu.memory_space<vmem>>, vector<1x1x32xf32>,
    return
  }
  func.func @transform_0(%arg0: i32, %arg1: memref<2x8xi32, #tpu.memory_space<smem>>) -> (i32, i32) {
    %c0_i32 = arith.constant 0 : i32
    %c0_i32_0 = arith.constant 0 : i32
    %c0_i32_1 = arith.constant 0 : i32
    return %c0_i32, %c0_i32_0 : i32, i32
  }
  func.func @transform_2(%arg0: i32, %arg1: memref<2x8xi32, #tpu.memory_space<smem>>) -> (i32, i32) {
    %c0_i32 = arith.constant 0 : i32
    %c0_i32_0 = arith.constant 0 : i32
    %c0_i32_1 = arith.constant 0 : i32
    return %c0_i32, %c0_i32_0 : i32, i32
  }
  func.func @transform_3(%arg0: i32, %arg1: memref<2x8xi32, #tpu.memory_space<smem>>) -> (i32, i32) {
    %c0_i32 = arith.constant 0 : i32
    %c0_i32_0 = arith.constant 0 : i32
    %c0_i32_1 = arith.constant 0 : i32
    return %c0_i32, %c0_i32_0 : i32, i32
  }
  func.func @transform_4(%arg0: i32, %arg1: memref<2x8xi32, #tpu.memory_space<smem>>) -> (i32, i32, i32) {
    %c0_i32 = arith.constant 0 : i32
    %c0_i32_0 = arith.constant 0 : i32
    %c0_i32_1 = arith.constant 0 : i32
    return %arg0, %c0_i32, %c0_i32_0 : i32, i32, i32
  }
}

</mosaic_0001>

<bundles_post_ra>
// kernel: model_forward.1
= control target key start
LH: loop header
LB: loop body
LE: loop exit
PB: predicated region body
PF: predicated region fallthrough
CT: control target
= control target key end

     0   :  { %s1577_s0 = inlined_call_operand.hbm [shape: s32[2,8], index: 0, kind: input, shape index: {}, may-alias: {0,1}]   ;;  %s1578_s1 = inlined_call_operand.hbm [shape: s32[2,8], index: 1, kind: input, shape index: {}, may-alias: {0,1}]   ;;  %s1579_s2 = inlined_call_operand.hbm [shape: f32[50,128], index: 2, kind: input, shape index: {}]   ;;  %s1580_s3 = inlined_call_operand.hbm [shape: bf16[128,128], index: 3, kind: input, shape index: {}]   ;;  %s1581_s4 = inlined_call_operand.vmem [shape: f32[1,128], index: 4, kind: input, shape index: {}]   ;;  %s1582_s5 = inlined_call_operand.hbm [shape: f32[2,1,32], index: 5, kind: output, shape index: {}]  }
   0x1   :  { %1586 = sst [smem:[#allocation43_spill]] %s1578_s1  ;;  %s857_s20 = scalar_lea.hbm %s1577_s0, 32 }
   0x2   :  { %1587 = sst [smem:[#allocation44_spill]] %s1580_s3  ;;  %p858_p0 = scmp.ne.s32.totalorder %s1577_s0, %s857_s20 }
   0x3   :  { %p861_p1 = scmp.lt.u32.totalorder %s857_s20, %s1577_s0 }
   0x5   :  { %p863_p2 = pnand %p861_p1, %p858_p0 }
   0x7   :  { %866 = shalt.err (!%p863_p2)  }
   0x8   :  { %s1205_s25 = smov [#allocation5]  }
   0x9   :  { %11 = dma.hbm_to_smem %s1577_s0, 32, %s1205_s25, [#allocation4] }
   0xa   :  { %1159 = dma.done.wait [#allocation4], 32 }
   0xb   :  { %1160 = vsyncadd [#allocation4], 4294967264 }
   0xc   :  { %13 = sfence }
   0xd   :  { %14 = vsyncpa [#allocation7], 0 }
   0xe   :  { %15 = vsyncpa [#allocation10], 0 }
   0xf   :  { %16 = vsyncpa [#allocation8], 0 }
  0x10   :  { %18 = vsyncpa [#allocation8 + $0x1], 0  ;;  %s1263_s28 = smov 0   ;;  %s1265_s29 = smov 0  }
  0x11   :  { %s1267_s30 = smov 0   ;;  %s1269_s6 = smov 0  }
  0x12 LB: > { %s1284_s0 = sadd.s32 4294967295, %s1203_s6   ;;  %s692_s7 = sadd.s32 4294967294, %s1203_s6   ;;  %s1203_s6 = sphi %s1269_s6, %s1608_s6   ;;  %s1199_s30 = sphi %s1267_s30, %s1607_s30   ;;  %s1195_s29 = sphi %s1265_s29, %s1606_s29   ;;  %s1191_s28 = sphi %s1263_s28, %s1605_s28  }
  0x13   : > { %s1288_s8 = sadd.s32 1, %s1203_s6   ;;  %s94_s9 = sadd.s32 1, %s1199_s30 }
  0x14   : > { %s91_s10 = ssub.s32 %s1203_s6, %s1288_s8  ;;  %p104_p3 = scmp.ne.s32.totalorder %s1199_s30, %s1195_s29 }
  0x15   : > { %p92_p4 = scmp.eq.s32.totalorder %s91_s10, 0  ;;  %p105_p5 = scmp.eq.s32.totalorder %s1284_s0, 1 }
  0x16   : > { %p110_p6 = scmp.ne.s32.totalorder %s1195_s29, %s1191_s28  ;;  %p111_p7 = scmp.eq.s32.totalorder %s692_s7, 1 }
  0x17   : > { %s1299_s11 = scalar_select %p92_p4, %s1199_s30, %s94_s9  }
  0x18   : > { %p1301_p8 = por %p105_p5, %p104_p3  ;;  %p1305_p9 = por %p111_p7, %p110_p6 }
  0x19   : > { %1588 = sst [smem:[#allocation42_spill]] %s1299_s11  ;;  %p693_p10 = scmp.ge.s32.totalorder %s1203_s6, 1 }
  0x1a   : > { %s1589_s12 = scalar_select %p1301_p8, 1, 0 }
  0x1b   : > { %s1590_s13 = scalar_select %p1305_p9, 1, 0 }
  0x1c   : > { %p118_p11 = scmp.lt.s32.totalorder %s1203_s6, 3  ;;  %p1583_p12 = scmp.eq.s32.totalorder %s1284_s0, 0 }
  0x1d   : > { %s1206_s15 = smov [#allocation6]   ;;  %s1207_s17 = smov [#allocation9]  }
  0x1e   : > { %p1312_p13 = pnand %p693_p10, %p118_p11  ;;  %s131_s16 = sshll.u32 %s1206_s15, 4  ;;  %s132_s16 = int_to_ptr.vmem [resolvable:$true] %s131_s16 }
  0x1f   : > { %s141_s18 = sshll.u32 %s1207_s17, 4  ;;  %s1593_s1 = sld [smem:[#allocation43_spill]]  ;;  %s1324_s18 = int_to_ptr.vmem [resolvable:$true] %s141_s18 }
  0x20   : > { %s1591_s14 = scalar_select %p1312_p13, 1, 0 }
  0x21   : > { %p780_p0 = pneg %p1312_p13 }
  0x23   : > { %p1320_p1 = pnand %p1583_p12, %p780_p0 }
  0x25   : > { %s867_s22 = scalar_lea.hbm %s1593_s1, 32  ;;  %p869_p3 = pneg %p1320_p1 }
  0x26   : > { %p868_p2 = scmp.ne.s32.totalorder %s1593_s1, %s867_s22  ;;  %p874_p6 = scmp.lt.u32.totalorder %s867_s22, %s1593_s1 }
  0x28   : > { %p870_p4 = pnand %p869_p3, %p868_p2 }
  0x2a   : > { %p871_p5 = pneg %p870_p4 }
  0x2c   : > { %p876_p7 = pnand %p874_p6, %p871_p5 }
  0x2e   : > { %879 = shalt.err (!%p876_p7)
}
  0x2f   : > { %s880_s27 = scalar_lea.vmem %s132_s16, 32  ;;  %p888_p12 = scmp.lt.s32.totalorder %s132_s16, %s132_s16 }
  0x30   : > { %p881_p10 = scmp.ne.s32.totalorder %s132_s16, %s880_s27  ;;  %p889_p9 = scmp.lt.s32.totalorder %s880_s27, %s880_s27 }
  0x32   : > { %p883_p11 = pnand %p881_p10, %p869_p3  ;;  %p890_p8 = por %p889_p9, %p888_p12 }
  0x34   : > { %p884_p0 = pneg %p883_p11 }
  0x36   : > { %p891_p13 = pnand %p890_p8, %p884_p0 }
  0x38   : > { %894 = shalt.err (!%p891_p13)
}
  0x39   : > { %783 = dma.hbm_to_vmem [thread:$0]  (!%p1320_p1), %s1593_s1, 32, %s132_s16, [#allocation7]  }
  0x3a   : > { %s1594_s3 = sld [smem:[#allocation44_spill]] }
  0x40   : > { %s895_s17 = scalar_lea.hbm %s1594_s3, 1024 }
  0x41   : > { %p896_p2 = scmp.ne.s32.totalorder %s1594_s3, %s895_s17  ;;  %p902_p12 = scmp.lt.u32.totalorder %s895_s17, %s1594_s3 }
  0x43   : > { %p898_p9 = pnand %p896_p2, %p869_p3 }
  0x45   : > { %p899_p8 = pneg %p898_p9 }
  0x47   : > { %p904_p13 = pnand %p902_p12, %p899_p8 }
  0x49   : > { %907 = shalt.err (!%p904_p13)
}
  0x4a   : > { %s908_s16 = scalar_lea.vmem %s1324_s18, 1024  ;;  %p916_p7 = scmp.lt.s32.totalorder %s1324_s18, %s1324_s18 }
  0x4b   : > { %p909_p4 = scmp.ne.s32.totalorder %s1324_s18, %s908_s16  ;;  %p917_p10 = scmp.lt.s32.totalorder %s908_s16, %s908_s16 }
  0x4d   : > { %p911_p5 = pnand %p909_p4, %p869_p3  ;;  %p918_p11 = por %p917_p10, %p916_p7 }
  0x4f   : > { %p912_p6 = pneg %p911_p5 }
  0x51   : > { %p919_p0 = pnand %p918_p11, %p912_p6 }
  0x53   : > { %922 = shalt.err (!%p919_p0)
}
  0x54   : > { %s1208_s24 = smov 64   ;;  %s1209_s25 = smov 4  }
  0x55   : > { %786 = dma.hbm_to_vmem [thread:$0]  (!%p1320_p1), %s1594_s3, 1024, %s1324_s18, [#allocation10], %s1208_s24, %s1208_s24, %s1209_s25  }
  0x56   : > { %p1595_p2 = scmp.ne.s32.totalorder %s1591_s14, 0 }
  0x57   : > { %p1596_p3 = scmp.eq.s32.totalorder (!%p1595_p2), %s1284_s0, 0 }
  0x58   : > { %160 = sbr.rel (%p1595_p2) target bundleno = 952 (0x3b8), region = 32 }
  0x5f   : > { %1162 = dma.done.wait (%p1596_p3), [#allocation7], 32   ;;  %p1597_p9 = pmov %p1596_p3 }
  0x60   : > { %p1598_p8 = pmov %p1596_p3 }
  0x61   : > { %1164 = vsyncadd (%p1597_p9), [#allocation7], 4294967264 }
  0x62   : > { %1166 = dma.done.wait (%p1598_p8), [#allocation10], 1024   ;;  %p1599_p12 = pmov %p1596_p3 }
  0x63   : > { %s731_s19 = scalar_lea.vmem [#allocation6], %s1203_s6  ;;  %vm322_vm0 = vcmask 57344   ;;  %v1210_v1 = vmov 0.0   ;;  %s1389_s14 = sshll.u32 %s1284_s0, 7 }
  0x64   : > { %1168 = vsyncadd (%p1599_p12), [#allocation10], 4294966272  ;;  %v733_v0 = vld [vmem:[%s731_s19 - $0x1] sm:$0x1]  ;;  %s184_s18 = sld [smem:[#allocation5 + %s1389_s14]]  ;;  %s198_s7 = sadd.s32 1, %s1389_s14 }
  0x65   : > { %vm319_vm1 = vcmp.ne.s32.totalorder %v733_v0, 1  ;;  %s1393_s9 = sld [smem:[#allocation5 + %s198_s7]]  ;;  %s215_s10 = sadd.s32 2, %s1389_s14 }
  0x66   : > { %v1385_v2 = vsel %vm319_vm1, 1.0, %v1210_v1  ;;  %s1396_s15 = sld [smem:[#allocation5 + %s215_s10]]  ;;  %s232_s17 = sadd.s32 3, %s1389_s14 }
  0x67   : > { %v323_v3 = vsel %vm322_vm0, %v1385_v2, 0.0  ;;  %s1399_s20 = sld [smem:[#allocation5 + %s232_s17]]  ;;  %s249_s21 = sadd.s32 4, %s1389_s14 }
  0x68   : > { %324 = vadd.xlane.f32.xlu0 %v323_v3  ;;  %s1402_s22 = sld [smem:[#allocation5 + %s249_s21]]  ;;  %s266_s23 = sadd.s32 5, %s1389_s14 }
  0x69   : > { %s1405_s16 = sld [smem:[#allocation5 + %s266_s23]]  ;;  %s1211_s25 = smov [#allocation2]  }
  0x6a   : > { %s700_s24 = sshll.u32 %s184_s18, 4  ;;  %s194_s26 = sshll.u32 %s1211_s25, 4  ;;  %s1410_s26 = int_to_ptr.vmem [resolvable:$true] %s194_s26 }
  0x6b   : > { %s186_s7 = scalar_lea.hbm %s1579_s2, %s700_s24  ;;  %s1415_s3 = scalar_lea.hbm %s1579_s2, 896 }
  0x6c   : > { %s923_s10 = scalar_lea.hbm %s186_s7, 16  ;;  %p926_p13 = scmp.lt.u32.totalorder %s186_s7, %s1579_s2 }
  0x6d   : > { %p924_p1 = scmp.ne.s32.totalorder %s186_s7, %s923_s10  ;;  %p927_p4 = scmp.lt.u32.totalorder %s1415_s3, %s923_s10 }
  0x6e   : > { %p929_p6 = scmp.lt.u32.totalorder %s923_s10, %s186_s7 }
  0x6f   : > { %p928_p5 = por %p927_p4, %p926_p13 }
  0x71   : > { %p930_p7 = por %p929_p6, %p928_p5 }
  0x73   : > { %p931_p10 = pnand %p930_p7, %p924_p1 }
  0x75   : > { %934 = shalt.err (!%p931_p10)  }
  0x76   : > { %s935_s18 = scalar_lea.vmem %s1410_s26, 16  ;;  %s1424_s1 = scalar_lea.vmem %s1410_s26, 128 }
  0x77   : > { %p936_p11 = scmp.ne.s32.totalorder %s1410_s26, %s935_s18  ;;  %p940_p0 = scmp.lt.s32.totalorder %s1410_s26, %s1410_s26 }
  0x78   : > { %p941_p2 = scmp.lt.s32.totalorder %s1424_s1, %s935_s18 }
  0x7a   : > { %p942_p3 = por %p941_p2, %p940_p0 }
  0x7c   : > { %p943_p9 = pnand %p942_p3, %p936_p11 }
  0x7e   : > { %946 = shalt.err (!%p943_p9)  }
  0x7f   : > { %197 = dma.hbm_to_vmem [thread:$0]  %s186_s7, 16, %s1410_s26, [#allocation3] }
  0x80   : > { %s701_s11 = sshll.u32 %s1393_s9, 4  ;;  %s1212_s27 = smov [#allocation2 + $0x1]  }
  0x81   : > { %s201_s25 = scalar_lea.hbm %s1579_s2, %s701_s11  ;;  %s211_s19 = sshll.u32 %s1212_s27, 4  ;;  %s212_s19 = int_to_ptr.vmem [resolvable:$true] %s211_s19 }
  0x82   : > { %s702_s10 = sshll.u32 %s1396_s15, 4  ;;  %s947_s17 = scalar_lea.hbm %s201_s25, 16 }
  0x83   : > { %p948_p8 = scmp.ne.s32.totalorder %s201_s25, %s947_s17  ;;  %p950_p12 = scmp.lt.u32.totalorder %s201_s25, %s1579_s2 }
  0x84   : > { %p951_p1 = scmp.lt.u32.totalorder %s1415_s3, %s947_s17  ;;  %p953_p4 = scmp.lt.u32.totalorder %s947_s17, %s201_s25 }
  0x86   : > { %p952_p13 = por %p951_p1, %p950_p12 }
  0x88   : > { %p954_p5 = por %p953_p4, %p952_p13 }
  0x8a   : > { %p955_p6 = pnand %p954_p5, %p948_p8 }
  0x8c   : > { %958 = shalt.err (!%p955_p6)  }
  0x8d   : > { %s959_s9 = scalar_lea.vmem %s212_s19, 16  ;;  %p964_p10 = scmp.lt.s32.totalorder %s212_s19, %s1410_s26 }
  0x8e   : > { %p960_p7 = scmp.ne.s32.totalorder %s212_s19, %s959_s9  ;;  %p965_p11 = scmp.lt.s32.totalorder %s1424_s1, %s959_s9 }
  0x90   : > { %p966_p0 = por %p965_p11, %p964_p10 }
  0x92   : > { %p967_p2 = pnand %p966_p0, %p960_p7 }
  0x94   : > { %970 = shalt.err (!%p967_p2)  }
  0x95   : > { %214 = dma.hbm_to_vmem [thread:$0]  %s201_s25, 16, %s212_s19, [#allocation3 + $0x1] }
  0x96   : > { %s218_s11 = scalar_lea.hbm %s1579_s2, %s702_s10  ;;  %s1213_s24 = smov [#allocation2 + $0x2]  }
  0x97   : > { %s228_s27 = sshll.u32 %s1213_s24, 4  ;;  %s971_s17 = scalar_lea.hbm %s218_s11, 16  ;;  %s229_s27 = int_to_ptr.vmem [resolvable:$true] %s228_s27 }
  0x98   : > { %p972_p3 = scmp.ne.s32.totalorder %s218_s11, %s971_s17  ;;  %p974_p9 = scmp.lt.u32.totalorder %s218_s11, %s1579_s2 }
  0x99   : > { %p975_p8 = scmp.lt.u32.totalorder %s1415_s3, %s971_s17  ;;  %p977_p1 = scmp.lt.u32.totalorder %s971_s17, %s218_s11 }
  0x9b   : > { %p976_p12 = por %p975_p8, %p974_p9 }
  0x9d   : > { %p978_p13 = por %p977_p1, %p976_p12 }
  0x9f   : > { %p979_p4 = pnand %p978_p13, %p972_p3 }
  0xa1   : > { %982 = shalt.err (!%p979_p4)  }
  0xa2   : > { %s983_s25 = scalar_lea.vmem %s229_s27, 16  ;;  %p988_p6 = scmp.lt.s32.totalorder %s229_s27, %s1410_s26 }
  0xa3   : > { %p984_p5 = scmp.ne.s32.totalorder %s229_s27, %s983_s25  ;;  %p989_p7 = scmp.lt.s32.totalorder %s1424_s1, %s983_s25 }
  0xa5   : > { %p990_p10 = por %p989_p7, %p988_p6 }
  0xa7   : > { %p991_p11 = pnand %p990_p10, %p984_p5 }
  0xa9   : > { %994 = shalt.err (!%p991_p11)  }
  0xaa   : > { %231 = dma.hbm_to_vmem [thread:$0]  %s218_s11, 16, %s229_s27, [#allocation3 + $0x2] }
  0xab   : > { %s703_s19 = sshll.u32 %s1399_s20, 4  ;;  %s1214_s7 = smov [#allocation2 + $0x3]  }
  0xac   : > { %s235_s15 = scalar_lea.hbm %s1579_s2, %s703_s19  ;;  %s245_s24 = sshll.u32 %s1214_s7, 4  ;;  %s246_s24 = int_to_ptr.vmem [resolvable:$true] %s245_s24 }
  0xad   : > { %s704_s17 = sshll.u32 %s1402_s22, 4  ;;  %s995_s21 = scalar_lea.hbm %s235_s15, 16 }
  0xae   : > { %p996_p0 = scmp.ne.s32.totalorder %s235_s15, %s995_s21  ;;  %p998_p2 = scmp.lt.u32.totalorder %s235_s15, %s1579_s2 }
  0xaf   : > { %p999_p3 = scmp.lt.u32.totalorder %s1415_s3, %s995_s21  ;;  %p1001_p8 = scmp.lt.u32.totalorder %s995_s21, %s235_s15 }
  0xb1   : > { %p1000_p9 = por %p999_p3, %p998_p2 }
  0xb3   : > { %p1002_p12 = por %p1001_p8, %p1000_p9 }
  0xb5   : > { %p1003_p1 = pnand %p1002_p12, %p996_p0 }
  0xb7   : > { %1006 = shalt.err (!%p1003_p1)  }
  0xb8   : > { %s1007_s20 = scalar_lea.vmem %s246_s24, 16  ;;  %p1012_p4 = scmp.lt.s32.totalorder %s246_s24, %s1410_s26 }
  0xb9   : > { %p1008_p13 = scmp.ne.s32.totalorder %s246_s24, %s1007_s20  ;;  %p1013_p5 = scmp.lt.s32.totalorder %s1424_s1, %s1007_s20 }
  0xbb   : > { %p1014_p6 = por %p1013_p5, %p1012_p4 }
  0xbd   : > { %p1015_p7 = pnand %p1014_p6, %p1008_p13 }
  0xbf   : > { %1018 = shalt.err (!%p1015_p7)  }
  0xc0   : > { %248 = dma.hbm_to_vmem [thread:$0]  %s235_s15, 16, %s246_s24, [#allocation3 + $0x3] }
  0xc1   : > { %s252_s27 = scalar_lea.hbm %s1579_s2, %s704_s17  ;;  %s1215_s19 = smov [#allocation2 + $0x4]  }
  0xc2   : > { %s262_s10 = sshll.u32 %s1215_s19, 4  ;;  %s705_s9 = sshll.u32 %s1405_s16, 4  ;;  %s263_s10 = int_to_ptr.vmem [resolvable:$true] %s262_s10 }
  0xc3   : > { %s1469_s18 = scalar_lea.hbm %s1579_s2, %s705_s9  ;;  %s1019_s25 = scalar_lea.hbm %s252_s27, 16 }
  0xc4   : > { %p1020_p10 = scmp.ne.s32.totalorder %s252_s27, %s1019_s25  ;;  %p1022_p11 = scmp.lt.u32.totalorder %s252_s27, %s1579_s2 }
  0xc5   : > { %p1023_p0 = scmp.lt.u32.totalorder %s1415_s3, %s1019_s25  ;;  %p1025_p3 = scmp.lt.u32.totalorder %s1019_s25, %s252_s27 }
  0xc7   : > { %p1024_p2 = por %p1023_p0, %p1022_p11 }
  0xc9   : > { %p1026_p9 = por %p1025_p3, %p1024_p2 }
  0xcb   : > { %p1027_p8 = pnand %p1026_p9, %p1020_p10 }
  0xcd   : > { %1030 = shalt.err (!%p1027_p8)  }
  0xce   : > { %s1031_s15 = scalar_lea.vmem %s263_s10, 16  ;;  %p1036_p1 = scmp.lt.s32.totalorder %s263_s10, %s1410_s26 }
  0xcf   : > { %p1032_p12 = scmp.ne.s32.totalorder %s263_s10, %s1031_s15  ;;  %p1037_p13 = scmp.lt.s32.totalorder %s1424_s1, %s1031_s15 }
  0xd1   : > { %p1038_p4 = por %p1037_p13, %p1036_p1 }
  0xd3   : > { %p1039_p5 = pnand %p1038_p4, %p1032_p12 }
  0xd5   : > { %1042 = shalt.err (!%p1039_p5)  }
  0xd6   : > { %265 = dma.hbm_to_vmem [thread:$0]  %s252_s27, 16, %s263_s10, [#allocation3 + $0x4] }
  0xd7   : > { %s283_s16 = sadd.s32 6, %s1389_s14  ;;  %s1216_s23 = smov [#allocation2 + $0x5]  }
  0xd8   : > { %s279_s24 = sshll.u32 %s1216_s23, 4  ;;  %s284_s17 = sld [smem:[#allocation5 + %s283_s16]]  ;;  %s280_s24 = int_to_ptr.vmem [resolvable:$true] %s279_s24 }
  0xd9   : > { %s1043_s22 = scalar_lea.hbm %s1469_s18, 16  ;;  %p1046_p7 = scmp.lt.u32.totalorder %s1469_s18, %s1579_s2 }
  0xda   : > { %p1044_p6 = scmp.ne.s32.totalorder %s1469_s18, %s1043_s22  ;;  %p1047_p10 = scmp.lt.u32.totalorder %s1415_s3, %s1043_s22 }
  0xdb   : > { %p1049_p0 = scmp.lt.u32.totalorder %s1043_s22, %s1469_s18 }
  0xdc   : > { %p1048_p11 = por %p1047_p10, %p1046_p7 }
  0xde   : > { %p1050_p2 = por %p1049_p0, %p1048_p11 }
  0xe0   : > { %p1051_p3 = pnand %p1050_p2, %p1044_p6 }
  0xe2   : > { %1054 = shalt.err (!%p1051_p3)  }
  0xe3   : > { %s1055_s27 = scalar_lea.vmem %s280_s24, 16  ;;  %p1060_p8 = scmp.lt.s32.totalorder %s280_s24, %s1410_s26 }
  0xe4   : > { %p1056_p9 = scmp.ne.s32.totalorder %s280_s24, %s1055_s27  ;;  %p1061_p12 = scmp.lt.s32.totalorder %s1424_s1, %s1055_s27 }
  0xe6   : > { %p1062_p1 = por %p1061_p12, %p1060_p8 }
  0xe8   : > { %p1063_p13 = pnand %p1062_p1, %p1056_p9 }
  0xea   : > { %1066 = shalt.err (!%p1063_p13)  }
  0xeb   : > { %282 = dma.hbm_to_vmem [thread:$0]  %s1469_s18, 16, %s280_s24, [#allocation3 + $0x5] }
  0xec   : > { %s1217_s10 = smov [#allocation2 + $0x6]   ;;  %s300_s7 = sadd.s32 7, %s1389_s14 }
  0xed   : > { %s296_s9 = sshll.u32 %s1217_s10, 4  ;;  %s301_s21 = sld [smem:[#allocation5 + %s300_s7]]  ;;  %s297_s9 = int_to_ptr.vmem [resolvable:$true] %s296_s9 }
  0xee   : > { %s706_s25 = sshll.u32 %s284_s17, 4  ;;  %s1218_s20 = smov [#allocation2 + $0x7]  }
  0xef   : > { %s313_s15 = sshll.u32 %s1218_s20, 4  ;;  %s286_s22 = scalar_lea.hbm %s1579_s2, %s706_s25  ;;  %s314_s15 = int_to_ptr.vmem [resolvable:$true] %s313_s15 }
  0xf0   : > { %s1067_s11 = scalar_lea.hbm %s286_s22, 16  ;;  %p1070_p5 = scmp.lt.u32.totalorder %s286_s22, %s1579_s2 }
  0xf1   : > { %p1068_p4 = scmp.ne.s32.totalorder %s286_s22, %s1067_s11  ;;  %p1071_p6 = scmp.lt.u32.totalorder %s1415_s3, %s1067_s11 }
  0xf2   : > { %p1073_p10 = scmp.lt.u32.totalorder %s1067_s11, %s286_s22 }
  0xf3   : > { %p1072_p7 = por %p1071_p6, %p1070_p5 }
  0xf5   : > { %p1074_p11 = por %p1073_p10, %p1072_p7 }
  0xf7   : > { %p1075_p0 = pnand %p1074_p11, %p1068_p4 }
  0xf9   : > { %1078 = shalt.err (!%p1075_p0)  }
  0xfa   : > { %s1079_s14 = scalar_lea.vmem %s297_s9, 16  ;;  %p1084_p3 = scmp.lt.s32.totalorder %s297_s9, %s1410_s26 }
  0xfb   : > { %p1080_p2 = scmp.ne.s32.totalorder %s297_s9, %s1079_s14  ;;  %p1085_p9 = scmp.lt.s32.totalorder %s1424_s1, %s1079_s14 }
  0xfd   : > { %p1086_p8 = por %p1085_p9, %p1084_p3 }
  0xff   : > { %p1087_p12 = pnand %p1086_p8, %p1080_p2 }
 0x101   : > { %1090 = shalt.err (!%p1087_p12)  }
 0x102   : > { %299 = dma.hbm_to_vmem [thread:$0]  %s286_s22, 16, %s297_s9, [#allocation3 + $0x6] }
 0x103   : > { %s707_s18 = sshll.u32 %s301_s21, 4 }
 0x104   : > { %s303_s10 = scalar_lea.hbm %s1579_s2, %s707_s18 }
 0x105   : > { %s1091_s7 = scalar_lea.hbm %s303_s10, 16  ;;  %p1094_p13 = scmp.lt.u32.totalorder %s303_s10, %s1579_s2 }
 0x106   : > { %p1092_p1 = scmp.ne.s32.totalorder %s303_s10, %s1091_s7  ;;  %p1095_p4 = scmp.lt.u32.totalorder %s1415_s3, %s1091_s7 }
 0x107   : > { %p1097_p6 = scmp.lt.u32.totalorder %s1091_s7, %s303_s10 }
 0x108   : > { %p1096_p5 = por %p1095_p4, %p1094_p13 }
 0x10a   : > { %p1098_p7 = por %p1097_p6, %p1096_p5 }
 0x10c   : > { %p1099_p10 = pnand %p1098_p7, %p1092_p1 }
 0x10e   : > { %1102 = shalt.err (!%p1099_p10)  }
 0x10f   : > { %s1103_s9 = scalar_lea.vmem %s314_s15, 16  ;;  %p1108_p0 = scmp.lt.s32.totalorder %s314_s15, %s1410_s26 }
 0x110   : > { %p1104_p11 = scmp.ne.s32.totalorder %s314_s15, %s1103_s9  ;;  %p1109_p2 = scmp.lt.s32.totalorder %s1424_s1, %s1103_s9 }
 0x112   : > { %p1110_p3 = por %p1109_p2, %p1108_p0 }
 0x114   : > { %p1111_p9 = pnand %p1110_p3, %p1104_p11 }
 0x116   : > { %1114 = shalt.err (!%p1111_p9)  }
 0x117   : > { %316 = dma.hbm_to_vmem [thread:$0]  %s303_s10, 16, %s314_s15, [#allocation3 + $0x7]  ;;  %v325_v4 = vpop.xlane.xlu0 %324 }
 0x118   : > { %843 = vrcp.f32 %v325_v4  ;;  %s1600_s3 = sand.u32 1, %s1195_s29  }
 0x119   : > { %s1511_s21 = scalar_lea.vmem [#allocation11], %s1600_s3 }
 0x122   : > { %v844_v5 = vpop.eup %843 }
 0x123   : > { %v327_v6 = vmul.f32 %v844_v5, %v1385_v2 }
 0x124   : > { %1169 = dma.done.wait [#allocation3], 16 }
 0x125   : > { %1170 = vsyncadd [#allocation3], 4294967280 }
 0x126   : > { %1171 = dma.done.wait [#allocation3 + $0x1], 16 }
 0x127   : > { %1172 = vsyncadd [#allocation3 + $0x1], 4294967280 }
 0x128   : > { %1173 = dma.done.wait [#allocation3 + $0x2], 16 }
 0x129   : > { %1174 = vsyncadd [#allocation3 + $0x2], 4294967280 }
 0x12a   : > { %1175 = dma.done.wait [#allocation3 + $0x3], 16 }
 0x12b   : > { %1176 = vsyncadd [#allocation3 + $0x3], 4294967280 }
 0x12c   : > { %1177 = dma.done.wait [#allocation3 + $0x4], 16 }
 0x12d   : > { %1178 = vsyncadd [#allocation3 + $0x4], 4294967280 }
 0x12e   : > { %1179 = dma.done.wait [#allocation3 + $0x5], 16 }
 0x12f   : > { %1180 = vsyncadd [#allocation3 + $0x5], 4294967280 }
 0x130   : > { %1181 = dma.done.wait [#allocation3 + $0x6], 16 }
 0x131   : > { %1182 = vsyncadd [#allocation3 + $0x6], 4294967280 }
 0x132   : > { %1183 = dma.done.wait [#allocation3 + $0x7], 16 }
 0x133   : > { %1184 = vsyncadd [#allocation3 + $0x7], 4294967280  ;;  %745 = vmatprep.subr.bf16.mxu0 %v1210_v1  ;;  %765 = vmatprep.subr.mxu1 %v1210_v1  ;;  %vm1219_vm2 = vmmov 0   ;;  %v845_v7 = vld [vmem:[#allocation9] sm:$0xff]   ;;  %v846_v8 = vld [vmem:[#allocation9 + $0x8] sm:$0xff]   ;;  %vm458_vm3 = vcmask 64512   ;;  %s1601_s19 = smov %s1600_s3 }
 0x134   : > { %761 = vmatprep.mubr.msk.bf16.mxu0 %vm1219_vm2, %v1210_v1  ;;  %767 = vmatprep.mubr.msk.f32.mxu1 %vm1219_vm2, %v1210_v1  ;;  %v847_v9 = vld [vmem:[#allocation9 + $0x10] sm:$0xff]   ;;  %v848_v10 = vld [vmem:[#allocation9 + $0x18] sm:$0xff]   ;;  %v849_v11 = vld [vmem:[#allocation9 + $0x20] sm:$0xff]   ;;  %vm533_vm4 = vcmask 1040384   ;;  %s720_s15 = sshll.u32 %s1284_s0, 4  ;;  %s555_s16 = sshll.u32 %s1511_s21, 4  ;;  %s1534_s16 = int_to_ptr.vmem [resolvable:$true] %s555_s16 }
 0x135   : > { %746 = vmatpush3.bf16.msra.mxu0 %v845_v7  ;;  %v850_v12 = vld [vmem:[#allocation9 + $0x28] sm:$0xff]   ;;  %v851_v13 = vld [vmem:[#allocation9 + $0x30] sm:$0xff]   ;;  %v852_v14 = vld [vmem:[#allocation9 + $0x38] sm:$0xff]   ;;  %vm540_vm5 = vcmask 253952   ;;  %s1532_s11 = scalar_lea.hbm %s1582_s5, %s720_s15  ;;  %s543_s27 = scalar_lea.sflag [#allocation8], %s1601_s19 }
 0x136   : > { %747 = vmatprep.subr.bf16.mxu0 %v1210_v1  ;;  %v344_v15 = vld [vmem:[#allocation2] sm:$0xff]  ;;  %s1115_s14 = scalar_lea.vmem %s1534_s16, 16  ;;  %p1602_p12 = scmp.ne.s32.totalorder %s1589_s12, 0 }
 0x137   : > { %v345_v16 = vpack.c.bf16 %v344_v15, %v344_v15  ;;  %v710_v17 = vld [vmem:[%s1581_s4] ss:$0 sm:$0xff]  ;;  %p1116_p8 = scmp.ne.s32.totalorder %s1534_s16, %s1115_s14  ;;  %s1220_s0 = smov [#allocation11]  }
 0x138   : > { %s1119_s18 = sshll.u32 %s1220_s0, 4  ;;  %s1120_s18 = int_to_ptr.vmem [resolvable:$false] %s1119_s18 }
 0x139   : > { %748 = vmatpush3.bf16.msra.mxu0 %v846_v8  ;;  %p1117_p1 = pnand %p1116_p8, %p1602_p12  ;;  %s1121_s24 = scalar_lea.vmem %s1120_s18, 32 }
 0x13a   : > { %749 = vmatprep.subr.bf16.mxu0 %v1210_v1  ;;  %p1122_p4 = scmp.lt.s32.totalorder %s1534_s16, %s1120_s18  ;;  %p1123_p5 = scmp.lt.s32.totalorder %s1121_s24, %s1115_s14 }
 0x13b   : > { %p1118_p13 = pneg %p1117_p1 }
 0x13c   : > { %p1124_p6 = por %p1123_p5, %p1122_p4 }
 0x13d   : > { %750 = vmatpush3.bf16.msra.mxu0 %v847_v9 }
 0x13e   : > { %751 = vmatprep.subr.bf16.mxu0 %v1210_v1  ;;  %p1125_p7 = pnand %p1124_p6, %p1118_p13 }
 0x141   : > { %752 = vmatpush3.bf16.msra.mxu0 %v848_v10 }
 0x142   : > { %753 = vmatprep.subr.bf16.mxu0 %v1210_v1 }
 0x145   : > { %754 = vmatpush3.bf16.msra.mxu0 %v849_v11 }
 0x146   : > { %755 = vmatprep.subr.bf16.mxu0 %v1210_v1 }
 0x149   : > { %756 = vmatpush3.bf16.msra.mxu0 %v850_v12 }
 0x14a   : > { %757 = vmatprep.subr.bf16.mxu0 %v1210_v1 }
 0x14d   : > { %758 = vmatpush3.bf16.msra.mxu0 %v851_v13 }
 0x14e   : > { %759 = vmatprep.subr.bf16.mxu0 %v1210_v1 }
 0x151   : > { %760 = vmatpush3.bf16.msra.mxu0 %v852_v14 }
 0x154   : > { %762 = vmatmul.mubr.bf16.vlgmr.msra.gmra.mrb[0].mxu0 %v345_v16 }
 0x227   : > { %v451_v18 = vpop.f32.mrb[0].mxu0 }
 0x228   : > { %v452_v19 = vadd.f32 %v710_v17, %v451_v18  ;;  %v763_v20 = vpop.f32.mrb[1].mxu0 }
 0x229   : > { %v454_v21 = vpop.f32.mrb[2].mxu0 }
 0x22a   : > { %853 = vtanh.f32 %v452_v19  ;;  %v764_v22 = vpop.f32.mrb[3].mxu0 }
 0x234   : > { %v854_v23 = vpop.eup %853 }
 0x235   : > { %766 = vmatpush3.msra.mxu1 %v854_v23 }
 0x236   : > { %768 = vmatmul.mubr.msk.f32.vlgmr.msra.gmra.mrb[0].mxu1 %vm458_vm3, %v327_v6 }
 0x309   : > { %v528_v24 = vpop.f32.mrb[0].mxu1 }
 0x30a   : > { %v769_v25 = vpop.f32.mrb[1].mxu1  ;;  %v532_v26 = vmul.f32 %v528_v24, %v528_v24 }
 0x30c   : > { %v534_v27 = vsel %vm533_vm4, %v532_v26, 0.0 }
 0x30d   : > { %535 = vadd.xlane.f32.xlu0 %v534_v27 }
 0x39a   : > { %v536_v28 = vpop.xlane.xlu0 %535 }
 0x39b   : > { %v537_v29 = vmax.f32 %v536_v28, 1e-24 }
 0x39d   : > { %855 = vrsqrt.f32 %v537_v29 }
 0x3a7   : > { %v856_v30 = vpop.eup %855 }
 0x3a8   : > { %v539_v31 = vmul.f32 %v856_v30, %v528_v24 }
 0x3aa   : > { %541 = vst.msk [vmem:[%s1511_s21] sm:$0x1] %vm540_vm5, %v539_v31 }
 0x3ab   : > { %1128 = shalt.err (!%p1125_p7)
}
 0x3ac   : > { %s1129_s17 = scalar_lea.hbm %s1532_s11, 16  ;;  %s1133_s25 = scalar_lea.hbm %s1582_s5, 32 }
 0x3ad   : > { %p1130_p10 = scmp.ne.s32.totalorder %s1532_s11, %s1129_s17  ;;  %p1134_p2 = scmp.lt.u32.totalorder %s1532_s11, %s1582_s5 }
 0x3ae   : > { %p1135_p3 = scmp.lt.u32.totalorder %s1133_s25, %s1129_s17  ;;  %p1137_p8 = scmp.lt.u32.totalorder %s1129_s17, %s1532_s11 }
 0x3af   : > { %p1131_p11 = pnand %p1130_p10, %p1602_p12 }
 0x3b0   : > { %p1136_p9 = por %p1135_p3, %p1134_p2 }
 0x3b1   : > { %p1132_p0 = pneg %p1131_p11 }
 0x3b2   : > { %p1138_p1 = por %p1137_p8, %p1136_p9 }
 0x3b4   : > { %p1139_p13 = pnand %p1138_p1, %p1132_p0 }
 0x3b6   : > { %1142 = shalt.err (!%p1139_p13)
}
 0x3b7   : > { %778 = dma.vmem_to_hbm [thread:$0]  (%p1602_p12), %s1534_s16, 16, %s1532_s11, %s543_s27  }
 0x3b8 PF: > { %p795_p4 = scmp.ge.s32.totalorder %s1203_s6, 2  ;;  %s567_s3 = sand.u32 1, %s1191_s28  }
 0x3b9   : > { %p1603_p5 = scmp.ne.s32.totalorder %s1590_s13, 0  ;;  %s568_s21 = scalar_lea.sflag [#allocation8], %s567_s3 }
 0x3bb   : > { %p788_p6 = pnand %p795_p4, %p1603_p5 }
 0x3bd   : > { %1186 = dma.done.wait (!%p788_p6), %s568_s21, 16  }
 0x3be   : > { %1188 = vsyncadd (!%p788_p6), %s568_s21, 4294967280  ;;  %s1604_s26 = sld [smem:[#allocation42_spill]]  ;;  %p21_p7 = scmp.ge.s32.totalorder %s1288_s8, 4  }
 0x3bf   : > { %s1605_s28 = smov %s1195_s29  ;;  %s1606_s29 = smov %s1199_s30 }
 0x3c0   : > { %s1608_s6 = smov %s1288_s8  ;;  %23 = sbr.rel (!%p21_p7) target bundleno = 18 (0x12), region = 135 }
 0x3c4   : > { %s1607_s30 = smov %s1604_s26 }
 0x3c7   :  { %572 = vsyncpa [#allocation7], 1 }
 0x3c8   :  { %574 = vsyncpa [#allocation7 + $0x1], 1 }
 0x3c9   :  { %575 = vsyncpa [#allocation10], 1 }
 0x3ca   :  { %576 = vsyncpa [#allocation8], 1 }
 0x3cb   :  { %578 = vsyncpa [#allocation8 + $0x1], 1 }
 0x3cc   :  { %579 = vsyncmov [#allocation3] }
 0x3cf   :  { %s580_s6 = vpop.sfrf %579 }
 0x3d0   :  { %p723_p12 = scmp.ne.s32.totalorder %s580_s6, 0 }
 0x3d2   :  { %584 = shalt.err (%p723_p12)  }
 0x3d3   :  { %586 = vsyncmov [#allocation3 + $0x1] }
 0x3d6   :  { %s587_s12 = vpop.sfrf %586 }
 0x3d7   :  { %p724_p10 = scmp.ne.s32.totalorder %s587_s12, 0 }
 0x3d9   :  { %591 = shalt.err (%p724_p10)  }
 0x3da   :  { %593 = vsyncmov [#allocation3 + $0x2] }
 0x3dd   :  { %s594_s13 = vpop.sfrf %593 }
 0x3de   :  { %p725_p11 = scmp.ne.s32.totalorder %s594_s13, 0 }
 0x3e0   :  { %598 = shalt.err (%p725_p11)  }
 0x3e1   :  { %600 = vsyncmov [#allocation3 + $0x3] }
 0x3e4   :  { %s601_s8 = vpop.sfrf %600 }
 0x3e5   :  { %p726_p0 = scmp.ne.s32.totalorder %s601_s8, 0 }
 0x3e7   :  { %605 = shalt.err (%p726_p0)  }
 0x3e8   :  { %607 = vsyncmov [#allocation3 + $0x4] }
 0x3eb   :  { %s608_s2 = vpop.sfrf %607 }
 0x3ec   :  { %p727_p2 = scmp.ne.s32.totalorder %s608_s2, 0 }
 0x3ee   :  { %612 = shalt.err (%p727_p2)  }
 0x3ef   :  { %614 = vsyncmov [#allocation3 + $0x5] }
 0x3f2   :  { %s615_s4 = vpop.sfrf %614 }
 0x3f3   :  { %p728_p3 = scmp.ne.s32.totalorder %s615_s4, 0 }
 0x3f5   :  { %619 = shalt.err (%p728_p3)  }
 0x3f6   :  { %621 = vsyncmov [#allocation3 + $0x6] }
 0x3f9   :  { %s622_s5 = vpop.sfrf %621 }
 0x3fa   :  { %p729_p9 = scmp.ne.s32.totalorder %s622_s5, 0 }
 0x3fc   :  { %626 = shalt.err (%p729_p9)  }
 0x3fd   :  { %628 = vsyncmov [#allocation3 + $0x7] }
 0x400   :  { %s629_s28 = vpop.sfrf %628 }
 0x401   :  { %p730_p8 = scmp.ne.s32.totalorder %s629_s28, 0 }
 0x403   :  { %633 = shalt.err (%p730_p8)  }

</bundles_post_ra>
